<compile_context>
chip_gen: v6e
topology: v6e:2x2x1
jax: 0.10.0
libtpu: 0.0.40
codegen_flags: <defaults>
</compile_context>

<pallas_src>
import numpy as np
import jax
import jax.numpy as jnp
from jax.experimental import pallas as pl
from jax.experimental.pallas import tpu as pltpu


def _sigmoid(z):
    # sigmoid(z) == 0.5 * (tanh(z/2) + 1): single EUP op + VPU fma (no exp+divide chain).
    return 0.5 * (jnp.tanh(0.5 * z) + 1.0)


def mask_ae_kernel(x_ref, w0, b0, w1, b1, w2, b2, w3, b3, out_ref):
    # x_ref: (tb, D0) row-major tile.  Transpose in-kernel (XLU slot, otherwise idle)
    # so the batch maps onto the 128-lane axis for all matmuls / elementwise ops.
    x_t = jnp.transpose(x_ref[...])                       # (D0, tb) f32

    def dot(w_ref, act):
        # bf16 operands on the MXU (bf16-native on v5e/v6e/v7x), f32 accumulate.
        return jnp.dot(w_ref[...], act.astype(jnp.bfloat16),
                       preferred_element_type=jnp.float32)

    # layer 0 + sigmoid
    h = _sigmoid(dot(w0, x_t) + b0[...])
    # TODO(synk): nn.Dropout(p=0.2) is treated as eval-mode identity (no RNG drop).
    # middle layers + relu
    h = jnp.maximum(dot(w1, h) + b1[...], 0.0)
    h = jnp.maximum(dot(w2, h) + b2[...], 0.0)
    # final layer + sigmoid
    o = _sigmoid(dot(w3, h) + b3[...])                    # (Dout, tb) f32
    # Transpose back so the caller receives row-major (B, Dout) with no external .T.
    out_ref[...] = jnp.transpose(o).astype(out_ref.dtype)


def make_params(key, dim_list):
    """Deterministic param + mask construction (mirrors nn.Linear init + 'replacement' mask)."""
    n_layer = len(dim_list)
    params = []
    for i in range(n_layer - 1):
        fan_in, fan_out = dim_list[i], dim_list[i + 1]
        key, kw, kb, km = jax.random.split(key, 4)
        bound = 1.0 / np.sqrt(fan_in)
        w = jax.random.uniform(kw, (fan_out, fan_in), jnp.float32, -bound, bound)
        b = jax.random.uniform(kb, (fan_out,), jnp.float32, -bound, bound)
        # 'replacement' mask: sample N indices with replacement, zero those positions
        n = fan_out * fan_in
        zero_idx = jax.random.randint(km, (n,), 0, n)
        mask = jnp.ones((n,), jnp.float32).at[zero_idx].set(0.0).reshape(fan_out, fan_in)
        params.append((w * mask, b))
    return params


def mask_linear_ae_forward(x, params, tb=8192):
    """x: (B, D0) row-major; params: list of ((out, in) masked weight, (out,) bias)."""
    B, D0 = x.shape
    Dout = params[-1][0].shape[0]

    # Batch tile: multiple of 128 (lane width), no larger than the 128-rounded batch.
    b_pad128 = pl.cdiv(B, 128) * 128
    tb = max(128, (min(int(tb), b_pad128) // 128) * 128)
    # Keep >=2 grid steps when the batch allows it, so the "parallel" batch axis
    # actually shards across both TensorCores on v7x megacore.
    if b_pad128 >= 256 and pl.cdiv(B, tb) < 2:
        tb = max(128, (pl.cdiv(b_pad128, 2) // 128) * 128)
    grid = (pl.cdiv(B, tb),)   # last block may be partial; Pallas clips it.

    flat_args = []
    # x tile: (tb, D0) is a fully contiguous HBM slab (D0 is the full row width).
    in_specs = [pl.BlockSpec((tb, D0), lambda i: (i, 0))]
    for w, b in params:
        w_bf = jnp.asarray(w, jnp.bfloat16)                 # bf16 MXU operand, cast once
        bb = jnp.asarray(b, jnp.float32).reshape(-1, 1)     # (out, 1) f32, broadcasts over lanes
        flat_args += [w_bf, bb]
        # Full-array blocks with constant index_map: grid-invariant, VMEM-resident.
        in_specs.append(pl.BlockSpec(w_bf.shape, lambda i: (0, 0)))
        in_specs.append(pl.BlockSpec(bb.shape, lambda i: (0, 0)))

    # Advisory cost estimate so XLA schedules the custom call sensibly.
    flops = int(2 * B * sum(int(w.shape[0]) * int(w.shape[1]) for w, _ in params))
    transcendentals = int(B * (int(params[0][0].shape[0]) + Dout))   # sigmoids (tanh)
    bytes_accessed = int(4 * B * (D0 + Dout)
                         + sum(2 * int(w.size) + 4 * int(b.size) for w, b in params))

    out = pl.pallas_call(
        mask_ae_kernel,
        out_shape=jax.ShapeDtypeStruct((B, Dout), jnp.float32),
        grid_spec=pltpu.PrefetchScalarGridSpec(
            num_scalar_prefetch=0,
            grid=grid,
            in_specs=in_specs,
            out_specs=pl.BlockSpec((tb, Dout), lambda i: (i, 0)),
        ),
        compiler_params=pltpu.CompilerParams(dimension_semantics=("parallel",)),
        cost_estimate=pl.CostEstimate(flops=flops,
                                      transcendentals=transcendentals,
                                      bytes_accessed=bytes_accessed),
    )(x.astype(jnp.float32), *flat_args)

    return out   # row-major (B, Dout), no external transpose / slice needed


def reference_forward(x, params):
    """Pure-JAX f32 reference matching the PyTorch forward (eval-mode dropout)."""
    w0, b0 = params[0]
    h = jax.nn.sigmoid(x @ w0.T + b0)
    for w, b in params[1:-1]:
        h = jnp.maximum(h @ w.T + b, 0.0)
    w3, b3 = params[-1]
    return jax.nn.sigmoid(h @ w3.T + b3)


if __name__ == "__main__":
    key = jax.random.PRNGKey(0)
    kx, kp = jax.random.split(key)

    input_dim_list = [32, 16, 8]
    dim_list = input_dim_list + input_dim_list[::-1][1:]   # [32, 16, 8, 16, 32]
    B = 300   # deliberately not a multiple of the tile: exercises the clipped last block

    x = jax.random.uniform(kx, (B, input_dim_list[0]), jnp.float32)
    params = make_params(kp, dim_list)

    out = mask_linear_ae_forward(x, params, tb=128)   # grid of 3 batch tiles (last partial)
    out = jax.block_until_ready(out)

    ref = reference_forward(x, params)
    # bf16 MXU operands (f32 accumulate) -> loosened tolerance vs the pure-f32 reference.
    np.testing.assert_allclose(np.asarray(out), np.asarray(ref), rtol=2e-2, atol=2e-2)

    print("KERNEL_OK")
</pallas_src>

<mosaic_0001>
module attributes {stable_mosaic.version = 11 : i64} {
  func.func @mask_ae_kernel(%arg0: i32, %arg1: memref<128x32xf32, #tpu.memory_space<vmem>>, %arg2: memref<16x32xbf16, #tpu.memory_space<vmem>>, %arg3: memref<16x1xf32, #tpu.memory_space<vmem>>, %arg4: memref<8x16xbf16, #tpu.memory_space<vmem>>, %arg5: memref<8x1xf32, #tpu.memory_space<vmem>>, %arg6: memref<16x8xbf16, #tpu.memory_space<vmem>>, %arg7: memref<16x1xf32, #tpu.memory_space<vmem>>, %arg8: memref<32x16xbf16, #tpu.memory_space<vmem>>, %arg9: memref<32x1xf32, #tpu.memory_space<vmem>>, %arg10: memref<128x32xf32, #tpu.memory_space<vmem>>) attributes {dimension_semantics = [#tpu.dimension_semantics<parallel>], iteration_bounds = array<i64: 3>, scalar_prefetch = 0 : i64, scratch_operands = 0 : i64, tpu.core_type = #tpu.core_type<tc>, window_params = [{transform_indices = @transform_0, window_bounds = array<i64: 128, 32>}, {pipeline_mode = #tpu.pipeline_mode<synchronous>, transform_indices = @transform_1, window_bounds = array<i64: 16, 32>}, {pipeline_mode = #tpu.pipeline_mode<synchronous>, transform_indices = @transform_2, window_bounds = array<i64: 16, 1>}, {pipeline_mode = #tpu.pipeline_mode<synchronous>, transform_indices = @transform_3, window_bounds = array<i64: 8, 16>}, {pipeline_mode = #tpu.pipeline_mode<synchronous>, transform_indices = @transform_4, window_bounds = array<i64: 8, 1>}, {pipeline_mode = #tpu.pipeline_mode<synchronous>, transform_indices = @transform_5, window_bounds = array<i64: 16, 8>}, {pipeline_mode = #tpu.pipeline_mode<synchronous>, transform_indices = @transform_6, window_bounds = array<i64: 16, 1>}, {pipeline_mode = #tpu.pipeline_mode<synchronous>, transform_indices = @transform_7, window_bounds = array<i64: 32, 16>}, {pipeline_mode = #tpu.pipeline_mode<synchronous>, transform_indices = @transform_8, window_bounds = array<i64: 32, 1>}, {transform_indices = @transform_9, window_bounds = array<i64: 128, 32>}]} {
    %c0 = arith.constant 0 : index
    %c0_0 = arith.constant 0 : index
    %0 = vector.load %arg1[%c0, %c0_0] : memref<128x32xf32, #tpu.memory_space<vmem>>, vector<128x32xf32>
    %1 = tpu.transpose %0, [1, 0] : vector<128x32xf32> -> vector<32x128xf32>
    %c0_1 = arith.constant 0 : index
    %c0_2 = arith.constant 0 : index
    %2 = vector.load %arg2[%c0_1, %c0_2] : memref<16x32xbf16, #tpu.memory_space<vmem>>, vector<16x32xbf16>
    %3 = arith.truncf %1 : vector<32x128xf32> to vector<32x128xbf16>
    %cst = arith.constant dense<0.000000e+00> : vector<16x128xf32>
    %4 = tpu.matmul %2, %3, %cst {dimension_numbers = #tpu.dot_dimension_numbers<[1], [0], [0], [1], [0, 0, 1, 1], [], []>} : vector<16x32xbf16>, vector<32x128xbf16>, vector<16x128xf32> -> vector<16x128xf32>
    %c0_3 = arith.constant 0 : index
    %c0_4 = arith.constant 0 : index
    %5 = vector.load %arg3[%c0_3, %c0_4] : memref<16x1xf32, #tpu.memory_space<vmem>>, vector<16x1xf32>
    %6 = vector.broadcast %5 : vector<16x1xf32> to vector<16x128xf32>
    %7 = arith.addf %4, %6 : vector<16x128xf32>
    %cst_5 = arith.constant 5.000000e-01 : f32
    %8 = vector.broadcast %cst_5 : f32 to vector<16x128xf32>
    %9 = arith.mulf %8, %7 : vector<16x128xf32>
    %10 = math.tanh %9 : vector<16x128xf32>
    %cst_6 = arith.constant 1.000000e+00 : f32
    %11 = vector.broadcast %cst_6 : f32 to vector<16x128xf32>
    %12 = arith.addf %10, %11 : vector<16x128xf32>
    %cst_7 = arith.constant 5.000000e-01 : f32
    %13 = vector.broadcast %cst_7 : f32 to vector<16x128xf32>
    %14 = arith.mulf %13, %12 : vector<16x128xf32>
    %c0_8 = arith.constant 0 : index
    %c0_9 = arith.constant 0 : index
    %15 = vector.load %arg4[%c0_8, %c0_9] : memref<8x16xbf16, #tpu.memory_space<vmem>>, vector<8x16xbf16>
    %16 = arith.truncf %14 : vector<16x128xf32> to vector<16x128xbf16>
    %cst_10 = arith.constant dense<0.000000e+00> : vector<8x128xf32>
    %17 = tpu.matmul %15, %16, %cst_10 {dimension_numbers = #tpu.dot_dimension_numbers<[1], [0], [0], [1], [0, 0, 1, 1], [], []>} : vector<8x16xbf16>, vector<16x128xbf16>, vector<8x128xf32> -> vector<8x128xf32>
    %c0_11 = arith.constant 0 : index
    %c0_12 = arith.constant 0 : index
    %18 = vector.load %arg5[%c0_11, %c0_12] : memref<8x1xf32, #tpu.memory_space<vmem>>, vector<8x1xf32>
    %19 = vector.broadcast %18 : vector<8x1xf32> to vector<8x128xf32>
    %20 = arith.addf %17, %19 : vector<8x128xf32>
    %cst_13 = arith.constant 0.000000e+00 : f32
    %21 = vector.broadcast %cst_13 : f32 to vector<8x128xf32>
    %22 = arith.maximumf %20, %21 : vector<8x128xf32>
    %c0_14 = arith.constant 0 : index
    %c0_15 = arith.constant 0 : index
    %23 = vector.load %arg6[%c0_14, %c0_15] : memref<16x8xbf16, #tpu.memory_space<vmem>>, vector<16x8xbf16>
    %24 = arith.truncf %22 : vector<8x128xf32> to vector<8x128xbf16>
    %cst_16 = arith.constant dense<0.000000e+00> : vector<16x128xf32>
    %25 = tpu.matmul %23, %24, %cst_16 {dimension_numbers = #tpu.dot_dimension_numbers<[1], [0], [0], [1], [0, 0, 1, 1], [], []>} : vector<16x8xbf16>, vector<8x128xbf16>, vector<16x128xf32> -> vector<16x128xf32>
    %c0_17 = arith.constant 0 : index
    %c0_18 = arith.constant 0 : index
    %26 = vector.load %arg7[%c0_17, %c0_18] : memref<16x1xf32, #tpu.memory_space<vmem>>, vector<16x1xf32>
    %27 = vector.broadcast %26 : vector<16x1xf32> to vector<16x128xf32>
    %28 = arith.addf %25, %27 : vector<16x128xf32>
    %cst_19 = arith.constant 0.000000e+00 : f32
    %29 = vector.broadcast %cst_19 : f32 to vector<16x128xf32>
    %30 = arith.maximumf %28, %29 : vector<16x128xf32>
    %c0_20 = arith.constant 0 : index
    %c0_21 = arith.constant 0 : index
    %31 = vector.load %arg8[%c0_20, %c0_21] : memref<32x16xbf16, #tpu.memory_space<vmem>>, vector<32x16xbf16>
    %32 = arith.truncf %30 : vector<16x128xf32> to vector<16x128xbf16>
    %cst_22 = arith.constant dense<0.000000e+00> : vector<32x128xf32>
    %33 = tpu.matmul %31, %32, %cst_22 {dimension_numbers = #tpu.dot_dimension_numbers<[1], [0], [0], [1], [0, 0, 1, 1], [], []>} : vector<32x16xbf16>, vector<16x128xbf16>, vector<32x128xf32> -> vector<32x128xf32>
    %c0_23 = arith.constant 0 : index
    %c0_24 = arith.constant 0 : index
    %34 = vector.load %arg9[%c0_23, %c0_24] : memref<32x1xf32, #tpu.memory_space<vmem>>, vector<32x1xf32>
    %35 = vector.broadcast %34 : vector<32x1xf32> to vector<32x128xf32>
    %36 = arith.addf %33, %35 : vector<32x128xf32>
    %cst_25 = arith.constant 5.000000e-01 : f32
    %37 = vector.broadcast %cst_25 : f32 to vector<32x128xf32>
    %38 = arith.mulf %37, %36 : vector<32x128xf32>
    %39 = math.tanh %38 : vector<32x128xf32>
    %cst_26 = arith.constant 1.000000e+00 : f32
    %40 = vector.broadcast %cst_26 : f32 to vector<32x128xf32>
    %41 = arith.addf %39, %40 : vector<32x128xf32>
    %cst_27 = arith.constant 5.000000e-01 : f32
    %42 = vector.broadcast %cst_27 : f32 to vector<32x128xf32>
    %43 = arith.mulf %42, %41 : vector<32x128xf32>
    %44 = tpu.transpose %43, [1, 0] : vector<32x128xf32> -> vector<128x32xf32>
    %c0_28 = arith.constant 0 : index
    %c0_29 = arith.constant 0 : index
    %45 = vector.load %arg10[%c0_28, %c0_29] : memref<128x32xf32, #tpu.memory_space<vmem>>, vector<128x32xf32>
    tpu.vector_store %arg10[%c0_28, %c0_29], %44 {strides = array<i32>} : memref<128x32xf32, #tpu.memory_space<vmem>>, vector<128x32xf32>,
    return
  }
  func.func @transform_0(%arg0: i32) -> (i32, i32) {
    %c0_i32 = arith.constant 0 : i32
    %c0_i32_0 = arith.constant 0 : i32
    return %arg0, %c0_i32 : i32, i32
  }
  func.func @transform_1(%arg0: i32) -> (i32, i32) {
    %c0_i32 = arith.constant 0 : i32
    %c0_i32_0 = arith.constant 0 : i32
    %c0_i32_1 = arith.constant 0 : i32
    return %c0_i32, %c0_i32_0 : i32, i32
  }
  func.func @transform_2(%arg0: i32) -> (i32, i32) {
    %c0_i32 = arith.constant 0 : i32
    %c0_i32_0 = arith.constant 0 : i32
    %c0_i32_1 = arith.constant 0 : i32
    return %c0_i32, %c0_i32_0 : i32, i32
  }
  func.func @transform_3(%arg0: i32) -> (i32, i32) {
    %c0_i32 = arith.constant 0 : i32
    %c0_i32_0 = arith.constant 0 : i32
    %c0_i32_1 = arith.constant 0 : i32
    return %c0_i32, %c0_i32_0 : i32, i32
  }
  func.func @transform_4(%arg0: i32) -> (i32, i32) {
    %c0_i32 = arith.constant 0 : i32
    %c0_i32_0 = arith.constant 0 : i32
    %c0_i32_1 = arith.constant 0 : i32
    return %c0_i32, %c0_i32_0 : i32, i32
  }
  func.func @transform_5(%arg0: i32) -> (i32, i32) {
    %c0_i32 = arith.constant 0 : i32
    %c0_i32_0 = arith.constant 0 : i32
    %c0_i32_1 = arith.constant 0 : i32
    return %c0_i32, %c0_i32_0 : i32, i32
  }
  func.func @transform_6(%arg0: i32) -> (i32, i32) {
    %c0_i32 = arith.constant 0 : i32
    %c0_i32_0 = arith.constant 0 : i32
    %c0_i32_1 = arith.constant 0 : i32
    return %c0_i32, %c0_i32_0 : i32, i32
  }
  func.func @transform_7(%arg0: i32) -> (i32, i32) {
    %c0_i32 = arith.constant 0 : i32
    %c0_i32_0 = arith.constant 0 : i32
    %c0_i32_1 = arith.constant 0 : i32
    return %c0_i32, %c0_i32_0 : i32, i32
  }
  func.func @transform_8(%arg0: i32) -> (i32, i32) {
    %c0_i32 = arith.constant 0 : i32
    %c0_i32_0 = arith.constant 0 : i32
    %c0_i32_1 = arith.constant 0 : i32
    return %c0_i32, %c0_i32_0 : i32, i32
  }
  func.func @transform_9(%arg0: i32) -> (i32, i32) {
    %c0_i32 = arith.constant 0 : i32
    %c0_i32_0 = arith.constant 0 : i32
    return %arg0, %c0_i32 : i32, i32
  }
}

</mosaic_0001>

<bundles_post_ra>
// kernel: tpu_custom_call.1
= control target key start
LH: loop header
LB: loop body
LE: loop exit
PB: predicated region body
PF: predicated region fallthrough
CT: control target
= control target key end

     0   :  { %s1357_s30 = smov 0   ;;  %s1359_s10 = smov 0   ;;  %s1603_s0 = inlined_call_operand.vmem [shape: f32[300,32], index: 0, kind: input, shape index: {}]   ;;  %s1604_s1 = inlined_call_operand.vmem [shape: bf16[16,32], index: 1, kind: input, shape index: {}]   ;;  %s1605_s2 = inlined_call_operand.vmem [shape: f32[16,1], index: 2, kind: input, shape index: {}]   ;;  %s1606_s3 = inlined_call_operand.vmem [shape: bf16[8,16], index: 3, kind: input, shape index: {}]   ;;  %s1607_s4 = inlined_call_operand.vmem [shape: f32[8,1], index: 4, kind: input, shape index: {}]   ;;  %s1608_s5 = inlined_call_operand.vmem [shape: bf16[16,8], index: 5, kind: input, shape index: {}]   ;;  %s1609_s6 = inlined_call_operand.vmem [shape: f32[16,1], index: 6, kind: input, shape index: {}]   ;;  %s1610_s7 = inlined_call_operand.vmem [shape: bf16[32,16], index: 7, kind: input, shape index: {}]   ;;  %s1611_s8 = inlined_call_operand.vmem [shape: f32[32,1], index: 8, kind: input, shape index: {}]   ;;  %s1612_s9 = inlined_call_operand.vmem [shape: f32[300,32], index: 9, kind: output, shape index: {}]  }
   0x1   :  { %s1361_s11 = smov 0  }
   0x2 LB: > { %s1370_s12 = sadd.s32 4294967295, %s1270_s11   ;;  %s1372_s13 = sadd.s32 1, %s1270_s11   ;;  %s1270_s11 = sphi %s1361_s11, %s1619_s11   ;;  %s1266_s10 = sphi %s1359_s10, %s1618_s10   ;;  %s1262_s30 = sphi %s1357_s30, %s1617_s30  }
   0x3   : > { %s217_s14 = ssub.s32 %s1270_s11, %s1372_s13  ;;  %s220_s15 = sadd.s32 1, %s1266_s10 }
   0x4   : > { %p218_p0 = scmp.eq.s32.totalorder %s217_s14, 0  ;;  %p230_p1 = scmp.ne.s32.totalorder %s1266_s10, %s1262_s30 }
   0x5   : > { %p231_p2 = scmp.eq.s32.totalorder %s1370_s12, 2  ;;  %p1038_p3 = scmp.ge.s32.totalorder %s1270_s11, 1 }
   0x6   : > { %s1380_s16 = scalar_select %p218_p0, %s1266_s10, %s220_s15  }
   0x7   : > { %p1382_p4 = por %p231_p2, %p230_p1  ;;  %p296_p5 = scmp.lt.s32.totalorder %s1270_s11, 4 }
   0x9   : > { %p297_p6 = pnand %p1038_p3, %p296_p5 }
   0xa   : > { %s1387_s18 = sshll.u32 (!%p297_p6), %s1370_s12, 4  ;;  %s332_s25 = sand.u32 (!%p297_p6), 1, %s1262_s30  }
   0xb   : > { %300 = sbr.rel (%p297_p6) target bundleno = 1245 (0x4dd), region = 56  ;;  %p340_p7 = scmp.lt.s32.totalorder (!%p297_p6), %s1387_s18, 37 }
   0xc   : > { %s1039_s26 = sshll.u32 (!%p297_p6), %s332_s25, 7 }
   0xd   : > { %s1469_s27 = scalar_lea.vmem (!%p297_p6), [#allocation2], %s1039_s26  }
  0x10   : > { %s341_s19 = scalar_select %p340_p7, %s1387_s18, 37  ;;  %v1304_v4 = vmov 0.0   ;;  %vm1305_vm0 = vmmov 0   ;;  %v407_v7 = vld [vmem:[%s1605_s2] sm:$0xff]  ;;  %v1306_v8 = vmov 0   ;;  %v408_v10 = vld [vmem:[%s1605_s2 + $0x8] sm:$0xff] }
  0x11   : > { %1081 = vmatprep.subr.bf16.mxu0 %v1304_v4  ;;  %1089 = vmatprep.subr.bf16.mxu1 %v1304_v4  ;;  %v479_v12 = vld [vmem:[%s1607_s4] sm:$0xff]  ;;  %v534_v16 = vld [vmem:[%s1609_s6 + $0x8] sm:$0xff]  ;;  %v608_v22 = vld [vmem:[%s1611_s8 + $0x10] sm:$0xff]  ;;  %vm424_vm1 = vcmask 261120   ;;  %vm485_vm2 = vcmask 130048   ;;  %vm554_vm3 = vcmask 1043456  }
  0x12   : > { %s1041_s20 = sshll.u32 %s341_s19, 3  ;;  %1085 = vmatprep.mubr.msk.bf16.mxu0 %vm1305_vm0, %v1304_v4  ;;  %1091 = vmatprep.mubr.msk.bf16.mxu1 %vm1305_vm0, %v1304_v4  ;;  %v533_v14 = vld [vmem:[%s1609_s6] sm:$0xff]  ;;  %v607_v20 = vld [vmem:[%s1611_s8 + $0x8] sm:$0xff]  ;;  %v609_v24 = vld [vmem:[%s1611_s8 + $0x18] sm:$0xff]  ;;  %vm550_vm4 = vcmask 64512   ;;  %s767_s30 = ssub.s32 (%p1382_p4), 38, %s1387_s18 }
  0x13   : > { %s1394_s23 = scalar_lea.vmem %s1603_s0, %s1041_s20  ;;  %1198 = vset.pattern.permute.xlu1 %v1306_v8  ;;  %v606_v18 = vld [vmem:[%s1611_s8] sm:$0xff]  ;;  %s1068_s28 = sshll.u32 (%p1382_p4), %s1370_s12, 7 }
  0x14   : > { %v355_v0 = vld [vmem:[%s1394_s23] sm:$0xff]  ;;  %v356_v1 = vld [vmem:[%s1394_s23 + $0x8] sm:$0xff]  ;;  %v357_v2 = vld [vmem:[%s1394_s23 + $0x10] sm:$0xff]  ;;  %411 = vperm.xlu1 %1198, %v407_v7   ;;  %p768_p8 = scmp.lt.s32.totalorder (%p1382_p4), %s767_s30, 16 }
  0x15   : > { %371 = vxpose.xlu0.b32.start [1/16] (narrow) %v355_v0, 32  ;;  %v358_v3 = vld [vmem:[%s1394_s23 + $0x18] sm:$0xff]  ;;  %v359_v5 = vld [vmem:[%s1394_s23 + $0x20] sm:$0xff]  ;;  %v360_v6 = vld [vmem:[%s1394_s23 + $0x28] sm:$0xff] }
  0x16   : > { %v361_v9 = vld [vmem:[%s1394_s23 + $0x30] sm:$0xff]  ;;  %v362_v11 = vld [vmem:[%s1394_s23 + $0x38] sm:$0xff]  ;;  %v363_v13 = vld [vmem:[%s1394_s23 + $0x40] sm:$0xff] }
  0x17   : > { %v364_v15 = vld [vmem:[%s1394_s23 + $0x48] sm:$0xff]  ;;  %v365_v17 = vld [vmem:[%s1394_s23 + $0x50] sm:$0xff]  ;;  %v366_v19 = vld [vmem:[%s1394_s23 + $0x58] sm:$0xff] }
  0x18   : > { %416 = vperm.xlu1 %1198, %v408_v10   ;;  %v367_v21 = vld [vmem:[%s1394_s23 + $0x60] sm:$0xff]  ;;  %v368_v23 = vld [vmem:[%s1394_s23 + $0x68] sm:$0xff]  ;;  %v369_v25 = vld [vmem:[%s1394_s23 + $0x70] sm:$0xff] }
  0x19   : > { %372 = vxpose.xlu0.b32.cont [2/16] (narrow) %v356_v1, 32  ;;  %v370_v26 = vld [vmem:[%s1394_s23 + $0x78] sm:$0xff]  ;;  %v1200_v33 = vld [vmem:[%s1604_s1] sm:$0xff]   ;;  %v1203_v10 = vld [vmem:[%s1610_s7 + $0x8] sm:$0xff]   ;;  %s1510_s23 = scalar_lea.vmem (%p1382_p4), %s1612_s9, %s1068_s28  }
  0x1a   : > { %v477_v51 = vld [vmem:[%s1606_s3] sm:$0xf] }
  0x1b   : > { %v1201_v61 = vld [vmem:[%s1608_s5] sm:$0xff]  }
  0x1c   : > { %482 = vperm.xlu1 %1198, %v479_v12   ;;  %v1202_v62 = vld [vmem:[%s1610_s7] sm:$0xff]  }
  0x1d   : > { %373 = vxpose.xlu0.b32.cont [3/16] (narrow) %v357_v2, 32 }
  0x20   : > { %537 = vperm.xlu1 %1198, %v533_v14  }
  0x21   : > { %374 = vxpose.xlu0.b32.cont [4/16] (narrow) %v358_v3, 32 }
  0x24   : > { %542 = vperm.xlu1 %1198, %v534_v16  }
  0x25   : > { %375 = vxpose.xlu0.b32.cont [5/16] (narrow) %v359_v5, 32 }
  0x28   : > { %612 = vperm.xlu1 %1198, %v606_v18  }
  0x29   : > { %376 = vxpose.xlu0.b32.cont [6/16] (narrow) %v360_v6, 32 }
  0x2c   : > { %617 = vperm.xlu1 %1198, %v607_v20  }
  0x2d   : > { %377 = vxpose.xlu0.b32.cont [7/16] (narrow) %v361_v9, 32 }
  0x30   : > { %622 = vperm.xlu1 %1198, %v608_v22  }
  0x31   : > { %378 = vxpose.xlu0.b32.cont [8/16] (narrow) %v362_v11, 32 }
  0x34   : > { %627 = vperm.xlu1 %1198, %v609_v24  }
  0x35   : > { %379 = vxpose.xlu0.b32.cont [9/16] (narrow) %v363_v13, 32 }
  0x39   : > { %380 = vxpose.xlu0.b32.cont [10/16] (narrow) %v364_v15, 32 }
  0x3d   : > { %381 = vxpose.xlu0.b32.cont [11/16] (narrow) %v365_v17, 32 }
  0x41   : > { %382 = vxpose.xlu0.b32.cont [12/16] (narrow) %v366_v19, 32 }
  0x45   : > { %383 = vxpose.xlu0.b32.cont [13/16] (narrow) %v367_v21, 32 }
  0x49   : > { %384 = vxpose.xlu0.b32.cont [14/16] (narrow) %v368_v23, 32 }
  0x4d   : > { %385 = vxpose.xlu0.b32.cont [15/16] (narrow) %v369_v25, 32 }
  0x51   : > { %386 = vxpose.xlu0.b32.end [16/16] (narrow) %v370_v26, 32 }
  0x7a   : > { %1199 = vset.pattern.permute.xlu0 %v1306_v8 }
  0x8f   : > { %v412_v34 = vpop.permute.xlu1 %411 }
  0x91   : > { %v387_v27 = vpop.trf.xlu0 }
  0x93   : > { %v417_v39 = vpop.permute.xlu1 %416 }
  0x95   : > { %v388_v28 = vpop.trf.xlu0 }
  0x96   : > { %v405_v32 = vpack.c.bf16 %v388_v28, %v387_v27 }
  0x97   : > { %v483_v52 = vpop.permute.xlu1 %482 }
  0x99   : > { %v389_v29 = vpop.trf.xlu0 }
  0x9b   : > { %v538_v63 = vpop.permute.xlu1 %537 }
  0x9d   : > { %v390_v30 = vpop.trf.xlu0 }
  0x9e   : > { %v406_v31 = vpack.c.bf16 %v390_v30, %v389_v29 }
  0x9f   : > { %v543_v3 = vpop.permute.xlu1 %542 }
  0xa0   : > { %1082 = vmatpush3.bf16.msra.mxu0 %v406_v31 }
  0xa1   : > { %1083 = vmatprep.subr.bf16.mxu0 %v1304_v4 }
  0xa3   : > { %v613_v11 = vpop.permute.xlu1 %612 }
  0xa4   : > { %1084 = vmatpush3.bf16.msra.mxu0 %v405_v32 }
  0xa7   : > { %1086 = vmatmul.mubr.msk.bf16.vlgmr.msra.gmra.mxu0 %vm424_vm1, %v1200_v33  ;;  %v618_v12 = vpop.permute.xlu1 %617 }
  0xa8   : > { %1103 = vmatprep.mubr.msk.bf16.mxu0 %vm485_vm2, %v1202_v62 }
  0xab   : > { %v623_v13 = vpop.permute.xlu1 %622 }
  0xaf   : > { %v628_v20 = vpop.permute.xlu1 %627 }
 0x167   : > { %v462_v35 = vpop.f32.mrf.mxu0 }
 0x168   : > { %v463_v36 = vadd.f32 %v462_v35, %v412_v34 }
 0x169   : > { %v1087_v37 = vpop.f32.mrf.mxu0 }
 0x16a   : > { %v469_v38 = vmul.f32 0.5, %v463_v36 }
 0x16b   : > { %v465_v40 = vpop.f32.mrf.mxu0 }
 0x16c   : > { %1204 = vtanh.f32 %v469_v38  ;;  %v466_v41 = vadd.f32 %v465_v40, %v417_v39 }
 0x16d   : > { %v1088_v42 = vpop.f32.mrf.mxu0 }
 0x16e   : > { %v470_v43 = vmul.f32 0.5, %v466_v41 }
 0x170   : > { %1206 = vtanh.f32 %v470_v43 }
 0x179   : > { %v1205_v44 = vpop.eup %1204 }
 0x17a   : > { %v473_v45 = vadd.f32 1.0, %v1205_v44 }
 0x17c   : > { %v475_v48 = vmul.f32 0.5, %v473_v45 }
 0x17d   : > { %v1207_v46 = vpop.eup %1206 }
 0x17e   : > { %v474_v47 = vadd.f32 1.0, %v1207_v46 }
 0x180   : > { %v476_v49 = vmul.f32 0.5, %v474_v47 }
 0x182   : > { %v478_v50 = vpack.c.bf16 %v476_v49, %v475_v48 }
 0x184   : > { %1090 = vmatpush3.bf16.msra.mxu1 %v478_v50 }
 0x185   : > { %1095 = vmatprep.subr.bf16.mxu1 %v1304_v4 }
 0x187   : > { %1092 = vmatmul.mubr.msk.bf16.vlgmr.msra.gmra.mxu1 %vm485_vm2, %v477_v51 }
 0x188   : > { %1097 = vmatprep.mubr.msk.bf16.mxu1 %vm1305_vm0, %v1304_v4 }
 0x247   : > { %v523_v53 = vpop.f32.mrf.mxu1 }
 0x248   : > { %v524_v54 = vadd.f32 %v523_v53, %v483_v52 }
 0x249   : > { %v1093_v55 = vpop.f32.mrf.mxu1 }
 0x24a   : > { %v529_v56 = vmax.f32 %v524_v54, 0.0 }
 0x24b   : > { %v526_v57 = vpop.f32.mrf.mxu1 }
 0x24c   : > { %v532_v58 = vpack.c.bf16 %v529_v56, %v529_v56 }
 0x24d   : > { %v1094_v59 = vpop.f32.mrf.mxu1 }
 0x24e   : > { %v556_v60 = vsel %vm554_vm3, %v532_v58, 0 }
 0x24f   : > { %1096 = vmatpush3.bf16.msra.mxu1 %v556_v60 }
 0x252   : > { %1098 = vmatmul.mubr.msk.bf16.vlgmr.msra.gmra.mxu1 %vm550_vm4, %v1201_v61 }
 0x312   : > { %v592_v0 = vpop.f32.mrf.mxu1 }
 0x313   : > { %v593_v2 = vadd.f32 %v592_v0, %v538_v63 }
 0x314   : > { %v1099_v1 = vpop.f32.mrf.mxu1 }
 0x315   : > { %v599_v7 = vmax.f32 %v593_v2, 0.0 }
 0x316   : > { %v595_v4 = vpop.f32.mrf.mxu1 }
 0x317   : > { %v596_v5 = vadd.f32 %v595_v4, %v543_v3 }
 0x318   : > { %v1100_v6 = vpop.f32.mrf.mxu1 }
 0x319   : > { %v600_v8 = vmax.f32 %v596_v5, 0.0 }
 0x31b   : > { %v605_v9 = vpack.c.bf16 %v600_v8, %v599_v7 }
 0x31d   : > { %1101 = vmatprep.subr.bf16.mxu0 %v605_v9 }
 0x31e   : > { %1102 = vmatpush3.bf16.msra.mxu0 %v605_v9 }
 0x321   : > { %1104 = vmatmul.mubr.msk.bf16.vlgmr.msra.gmra.mxu0 %vm485_vm2, %v1203_v10 }
 0x3e1   : > { %v1105_v14 = vpop.f32.mrf.mxu0 }
 0x3e2   : > { %v689_v15 = vadd.f32 %v1105_v14, %v623_v13 }
 0x3e3   : > { %v680_v16 = vpop.f32.mrf.mxu0 }
 0x3e4   : > { %v681_v17 = vadd.f32 %v680_v16, %v613_v11  ;;  %v697_v21 = vmul.f32 0.5, %v689_v15 }
 0x3e5   : > { %v1106_v18 = vpop.f32.mrf.mxu0 }
 0x3e6   : > { %v695_v19 = vmul.f32 0.5, %v681_v17  ;;  %v692_v23 = vadd.f32 %v1106_v18, %v628_v20 }
 0x3e7   : > { %v683_v22 = vpop.f32.mrf.mxu0 }
 0x3e8   : > { %1208 = vtanh.f32 %v695_v19  ;;  %v684_v24 = vadd.f32 %v683_v22, %v618_v12  ;;  %v698_v26 = vmul.f32 0.5, %v692_v23 }
 0x3e9   : > { %1210 = vtanh.f32 %v697_v21 }
 0x3ea   : > { %v696_v25 = vmul.f32 0.5, %v684_v24 }
 0x3ec   : > { %1212 = vtanh.f32 %v696_v25 }
 0x3ed   : > { %1214 = vtanh.f32 %v698_v26 }
 0x3f5   : > { %v1209_v27 = vpop.eup %1208 }
 0x3f6   : > { %v703_v28 = vadd.f32 1.0, %v1209_v27  ;;  %v1211_v29 = vpop.eup %1210 }
 0x3f7   : > { %v705_v33 = vadd.f32 1.0, %v1211_v29 }
 0x3f8   : > { %v707_v30 = vmul.f32 0.5, %v703_v28 }
 0x3f9   : > { %v1213_v31 = vpop.eup %1212  ;;  %v709_v36 = vmul.f32 0.5, %v705_v33 }
 0x3fa   : > { %v704_v32 = vadd.f32 1.0, %v1213_v31  ;;  %711 = vxpose.xlu1.b32.start [1/4] (short) %v707_v30, 128  ;;  %v1215_v35 = vpop.eup %1214 }
 0x3fb   : > { %v706_v37 = vadd.f32 1.0, %v1215_v35 }
 0x3fc   : > { %v708_v34 = vmul.f32 0.5, %v704_v32 }
 0x3fd   : > { %v710_v38 = vmul.f32 0.5, %v706_v37 }
 0x3fe   : > { %712 = vxpose.xlu1.b32.cont [2/4] (short) %v708_v34, 128 }
 0x402   : > { %713 = vxpose.xlu1.b32.cont [3/4] (short) %v709_v36, 128 }
 0x406   : > { %714 = vxpose.xlu1.b32.end [4/4] (short) %v710_v38, 128 }
 0x476   : > { %v727_v39 = vpop.trf.xlu1 }
 0x477   : > { %743 = vst.msk [vmem:[%s1469_s27] sm:$0xff] %vm424_vm1, %v727_v39 }
 0x47a   : > { %v728_v40 = vpop.trf.xlu1 }
 0x47b   : > { %744 = vst.msk [vmem:[%s1469_s27 + $0x8] sm:$0xff] %vm424_vm1, %v728_v40 }
 0x47e   : > { %v729_v41 = vpop.trf.xlu1 }
 0x47f   : > { %745 = vst.msk [vmem:[%s1469_s27 + $0x10] sm:$0xff] %vm424_vm1, %v729_v41 }
 0x482   : > { %v730_v42 = vpop.trf.xlu1 }
 0x483   : > { %746 = vst.msk [vmem:[%s1469_s27 + $0x18] sm:$0xff] %vm424_vm1, %v730_v42 }
 0x486   : > { %v731_v43 = vpop.trf.xlu1 }
 0x487   : > { %747 = vst.msk [vmem:[%s1469_s27 + $0x20] sm:$0xff] %vm424_vm1, %v731_v43 }
 0x48a   : > { %v732_v44 = vpop.trf.xlu1 }
 0x48b   : > { %748 = vst.msk [vmem:[%s1469_s27 + $0x28] sm:$0xff] %vm424_vm1, %v732_v44 }
 0x48e   : > { %v733_v45 = vpop.trf.xlu1 }
 0x48f   : > { %749 = vst.msk [vmem:[%s1469_s27 + $0x30] sm:$0xff] %vm424_vm1, %v733_v45 }
 0x492   : > { %v734_v46 = vpop.trf.xlu1 }
 0x493   : > { %750 = vst.msk [vmem:[%s1469_s27 + $0x38] sm:$0xff] %vm424_vm1, %v734_v46 }
 0x496   : > { %v735_v47 = vpop.trf.xlu1 }
 0x497   : > { %751 = vst.msk [vmem:[%s1469_s27 + $0x40] sm:$0xff] %vm424_vm1, %v735_v47 }
 0x49a   : > { %v736_v48 = vpop.trf.xlu1 }
 0x49b   : > { %752 = vst.msk [vmem:[%s1469_s27 + $0x48] sm:$0xff] %vm424_vm1, %v736_v48 }
 0x49e   : > { %v737_v49 = vpop.trf.xlu1 }
 0x49f   : > { %753 = vst.msk [vmem:[%s1469_s27 + $0x50] sm:$0xff] %vm424_vm1, %v737_v49 }
 0x4a2   : > { %v738_v50 = vpop.trf.xlu1 }
 0x4a3   : > { %754 = vst.msk [vmem:[%s1469_s27 + $0x58] sm:$0xff] %vm424_vm1, %v738_v50 }
 0x4a6   : > { %v739_v51 = vpop.trf.xlu1 }
 0x4a7   : > { %755 = vst.msk [vmem:[%s1469_s27 + $0x60] sm:$0xff] %vm424_vm1, %v739_v51 }
 0x4aa   : > { %v740_v52 = vpop.trf.xlu1 }
 0x4ab   : > { %756 = vst.msk [vmem:[%s1469_s27 + $0x68] sm:$0xff] %vm424_vm1, %v740_v52 }
 0x4ae   : > { %v741_v53 = vpop.trf.xlu1 }
 0x4af   : > { %757 = vst.msk [vmem:[%s1469_s27 + $0x70] sm:$0xff] %vm424_vm1, %v741_v53  ;;  %765 = sbr.rel (!%p1382_p4) target bundleno = 1245 (0x4dd), region = 60 }
 0x4b2   : > { %v742_v54 = vpop.trf.xlu1 }
 0x4b3   : > { %758 = vst.msk [vmem:[%s1469_s27 + $0x78] sm:$0xff] %vm424_vm1, %v742_v54 }
 0x4b4   : > { %s1621_s30 = smov (!%p768_p8, %s767_s30), 16 }
 0x4b5   : > { %s1053_s14 = sshll.u32 %s1621_s30, 7 }
 0x4b6   : > { %p1056_p9 = scmp.eq.s32.totalorder %s1053_s14, 0 }
 0x4b7   : > { %s1516_s15 = sshrl.u32 (!%p1056_p9), %s1621_s30, 4 }
 0x4b8   : > { %776 = sbr.rel (%p1056_p9) target bundleno = 1245 (0x4dd), region = 64  ;;  %p1057_p10 = scmp.le.s32.totalorder (!%p1056_p9), %s1516_s15, 0 }
 0x4bd   : > { %991 = sbr.rel (%p1057_p10) target bundleno = 1228 (0x4cc), region = 140  ;;  %s1614_s12 = smov (!%p1057_p10), %s1510_s23 }
 0x4be   : > { %s1615_s17 = smov (!%p1057_p10), %s1469_s27  ;;  %s1525_s18 = smov (!%p1057_p10), 0  }
 0x4bf   : > { %s1527_s19 = smov (!%p1057_p10), 0  }
 0x4c2 LB: >> { %v869_v55 = vld [vmem:[%s1278_s17] sm:$0xff]  ;;  %v871_v56 = vld [vmem:[%s1278_s17 + $0x8] sm:$0xff]  ;;  %v873_v57 = vld [vmem:[%s1278_s17 + $0x10] sm:$0xff]  ;;  %s901_s20 = sadd.s32 1, %s1282_s18  ;;  %s863_s19 = sadd.s32 1, %s1286_s19   ;;  %s1286_s19 = sphi %s1527_s19, %s863_s19   ;;  %s1282_s18 = sphi %s1525_s18, %s1616_s18   ;;  %s1278_s17 = sphi %s1615_s17, %s906_s17   ;;  %s1274_s12 = sphi %s1614_s12, %s907_s12  }
 0x4c3   : >> { %870 = vst [vmem:[%s1274_s12] sm:$0xff] %v869_v55  ;;  %872 = vst [vmem:[%s1274_s12 + $0x8] sm:$0xff] %v871_v56  ;;  %v875_v58 = vld [vmem:[%s1278_s17 + $0x18] sm:$0xff]  ;;  %v877_v59 = vld [vmem:[%s1278_s17 + $0x20] sm:$0xff]  ;;  %p902_p11 = scmp.ge.s32.totalorder %s901_s20, %s1516_s15  ;;  %p862_p12 = scmp.ge.s32.totalorder %s863_s19, %s1516_s15 }
 0x4c4   : >> { %874 = vst [vmem:[%s1274_s12 + $0x10] sm:$0xff] %v873_v57  ;;  %v879_v60 = vld [vmem:[%s1278_s17 + $0x28] sm:$0xff]  ;;  %876 = vst [vmem:[%s1274_s12 + $0x18] sm:$0xff] %v875_v58  ;;  %v881_v61 = vld [vmem:[%s1278_s17 + $0x30] sm:$0xff] }
 0x4c5   : >> { %878 = vst [vmem:[%s1274_s12 + $0x20] sm:$0xff] %v877_v59  ;;  %880 = vst [vmem:[%s1274_s12 + $0x28] sm:$0xff] %v879_v60  ;;  %v883_v62 = vld [vmem:[%s1278_s17 + $0x38] sm:$0xff]  ;;  %v885_v63 = vld [vmem:[%s1278_s17 + $0x40] sm:$0xff]  ;;  %s1623_s20 = smov (%p902_p11, %s901_s20), 0 }
 0x4c6   : >> { %882 = vst [vmem:[%s1274_s12 + $0x30] sm:$0xff] %v881_v61  ;;  %884 = vst [vmem:[%s1274_s12 + $0x38] sm:$0xff] %v883_v62  ;;  %v887_v0 = vld [vmem:[%s1278_s17 + $0x48] sm:$0xff]  ;;  %v889_v1 = vld [vmem:[%s1278_s17 + $0x50] sm:$0xff]  ;;  %s1058_s21 = sshll.u32 %s1623_s20, 7  ;;  %s1616_s18 = smov %s1623_s20 }
 0x4c7   : >> { %886 = vst [vmem:[%s1274_s12 + $0x40] sm:$0xff] %v885_v63  ;;  %v891_v2 = vld [vmem:[%s1278_s17 + $0x58] sm:$0xff]  ;;  %888 = vst [vmem:[%s1274_s12 + $0x48] sm:$0xff] %v887_v0  ;;  %v893_v3 = vld [vmem:[%s1278_s17 + $0x60] sm:$0xff]  ;;  %865 = sbr.rel (!%p862_p12) target bundleno = 1218 (0x4c2), region = 146 }
 0x4c8   : >> { %890 = vst [vmem:[%s1274_s12 + $0x50] sm:$0xff] %v889_v1  ;;  %892 = vst [vmem:[%s1274_s12 + $0x58] sm:$0xff] %v891_v2  ;;  %v895_v4 = vld [vmem:[%s1278_s17 + $0x68] sm:$0xff]  ;;  %v897_v5 = vld [vmem:[%s1278_s17 + $0x70] sm:$0xff] }
 0x4c9   : >> { %894 = vst [vmem:[%s1274_s12 + $0x60] sm:$0xff] %v893_v3  ;;  %896 = vst [vmem:[%s1274_s12 + $0x68] sm:$0xff] %v895_v4  ;;  %v899_v6 = vld [vmem:[%s1278_s17 + $0x78] sm:$0xff]  ;;  %s906_s17 = scalar_lea.vmem %s1469_s27, %s1058_s21 [#allocation2]  }
 0x4ca   : >> { %898 = vst [vmem:[%s1274_s12 + $0x70] sm:$0xff] %v897_v5  ;;  %900 = vst [vmem:[%s1274_s12 + $0x78] sm:$0xff] %v899_v6  ;;  %s907_s12 = scalar_lea.vmem %s1510_s23, %s1058_s21  }
 0x4cc PF: > { %s1585_s22 = sand.u32 15, %s1621_s30   ;;  %s1069_s24 = sshll.u32 %s1516_s15, 7 }
 0x4cd   : > { %s912_s25 = scalar_lea.vmem %s1469_s27, %s1069_s24 [#allocation2]   ;;  %s914_s26 = scalar_lea.vmem %s1510_s23, %s1069_s24  }
 0x4ce   : > { %p1063_p13 = scmp.le.s32.totalorder %s1585_s22, 0 }
 0x4cf   : > { %s1288_s28 = smov (!%p1063_p13), %s914_s26   ;;  %s1292_s29 = smov (!%p1063_p13), %s912_s25  }
 0x4d0   : > { %1005 = sbr.rel (%p1063_p13) target bundleno = 1245 (0x4dd), region = 151  ;;  %s1296_s11 = smov (!%p1063_p13), 0  }
 0x4d1   : > { %s1300_s14 = smov (!%p1063_p13), 0  }
 0x4d5 LB: >> { %v924_v7 = vld [vmem:[%s1294_s29] sm:$0xff]  ;;  %s926_s30 = sadd.s32 1, %s1298_s11  ;;  %s918_s14 = sadd.s32 1, %s1302_s14   ;;  %s1302_s14 = sphi %s1300_s14, %s918_s14   ;;  %s1298_s11 = sphi %s1296_s11, %s1297_s11   ;;  %s1294_s29 = sphi %s1292_s29, %s931_s29   ;;  %s1290_s28 = sphi %s1288_s28, %s932_s28  }
 0x4d6   : >> { %925 = vst [vmem:[%s1290_s28] sm:$0xff] %v924_v7  ;;  %p927_p0 = scmp.ge.s32.totalorder %s926_s30, %s1585_s22  ;;  %p917_p1 = scmp.ge.s32.totalorder %s918_s14, %s1585_s22 }
 0x4d8   : >> { %s1625_s30 = smov (%p927_p0, %s926_s30), 0  ;;  %920 = sbr.rel (!%p917_p1) target bundleno = 1237 (0x4d5), region = 157 }
 0x4d9   : >> { %s1064_s27 = sshll.u32 %s1625_s30, 3  ;;  %s1297_s11 = smov %s1625_s30  }
 0x4da   : >> { %s931_s29 = scalar_lea.vmem %s912_s25, %s1064_s27 [#allocation2]   ;;  %s932_s28 = scalar_lea.vmem %s914_s26, %s1064_s27  }
 0x4dd PF: > { %p16_p2 = scmp.ge.s32.totalorder %s1372_s13, 5   ;;  %s1617_s30 = smov %s1266_s10 }
 0x4de   : > { %s1618_s10 = smov %s1380_s16  ;;  %s1619_s11 = smov %s1372_s13 }
 0x4df   :  { %18 = sbr.rel (!%p16_p2) target bundleno = 2 (0x2), region = 168 }

</bundles_post_ra>
